<compile_context>
chip_gen: v7x
topology: tpu7x:2x2x1
jax: 0.10.0
libtpu: 0.0.40
codegen_flags: <defaults>
</compile_context>

<pallas_src>
import jax
import jax.numpy as jnp
from jax.experimental import pallas as pl
from jax.experimental.pallas import tpu as pltpu

NEG_SLOPE = 0.01  # F.leaky_relu default negative_slope


def _leaky_relu(x):
    return jnp.where(x >= 0, x, NEG_SLOPE * x)


def _reward_pair_kernel(
    eef_ref, obj_ref,                      # (2T, 3) bf16, (2T, 256) bf16
    w_obj1, b_obj1, w_obj2, b_obj2,        # weights bf16 (in,out), biases f32 (1,out)
    w_eef1, b_eef1, w_eef2, b_eef2,
    w_fc1e, w_fc1o, b_fc1,                 # fc1 weight split: eef half / obj half
    w_fc2, b_fc2,
    w_fc3, b_fc3,                          # w_fc3 as (1,64) bf16, b_fc3 (1,1) f32
    out_ref,                               # (1, 1, 4) f32: [sum_i, sum_j, abs_i, abs_j]
):
    f32 = jnp.float32
    bf16 = jnp.bfloat16

    def dot(x, w_ref):
        # bf16 operands, f32 MXU accumulation.
        return jnp.dot(x.astype(bf16), w_ref[...], preferred_element_type=f32)

    # --- object embedding branch: 256 -> 128 -> 128 ---
    obj = _leaky_relu(dot(obj_ref[...], w_obj1) + b_obj1[...])
    obj = _leaky_relu(dot(obj, w_obj2) + b_obj2[...])

    # --- end-effector branch: 3 -> 128 -> 128 ---
    # K=3 contraction as an explicit broadcast-MAC (avoids a degenerate MXU
    # matmul); bf16 x bf16 products are exact in f32.
    e = eef_ref[...].astype(f32)
    w1 = w_eef1[...].astype(f32)
    eef = (e[:, 0:1] * w1[0:1, :]
           + e[:, 1:2] * w1[1:2, :]
           + e[:, 2:3] * w1[2:3, :]) + b_eef1[...]
    eef = _leaky_relu(eef)
    eef = _leaky_relu(dot(eef, w_eef2) + b_eef2[...])

    # --- head: (eef ++ obj) -> 128 -> 64 -> 1, concat removed via split fc1 ---
    x = _leaky_relu(dot(eef, w_fc1e) + dot(obj, w_fc1o) + b_fc1[...])
    x = _leaky_relu(dot(x, w_fc2) + b_fc2[...])

    # fc3 (out_features = 1) as broadcast-multiply + lane reduction.
    xq = x.astype(bf16).astype(f32)
    r = jnp.sum(xq * w_fc3[...].astype(f32), axis=-1, keepdims=True) + b_fc3[...]  # (2T, 1)

    # Per-trajectory reductions.  Rows [0, T) are trajectory i, [T, 2T) are j;
    # T is a multiple of 8 so the static slices stay sublane-aligned.
    t = r.shape[0] // 2
    r_abs = jnp.abs(r)
    sum_i = jnp.sum(r[:t], keepdims=True)       # (1, 1)
    sum_j = jnp.sum(r[t:], keepdims=True)
    abs_i = jnp.sum(r_abs[:t], keepdims=True)
    abs_j = jnp.sum(r_abs[t:], keepdims=True)
    out_ref[...] = jnp.concatenate([sum_i, sum_j, abs_i, abs_j], axis=1).reshape(1, 1, 4)


def init_params(key):
    """torch.nn.Linear-style init: uniform(-1/sqrt(fan_in), 1/sqrt(fan_in)).
    Weights stored (in_features, out_features) so y = x @ W + b."""
    dims = [
        ("obj_fc1", 256, 128),
        ("obj_fc2", 128, 128),
        ("eef_fc1", 3, 128),
        ("eef_fc2", 128, 128),
        ("fc1", 256, 128),
        ("fc2", 128, 64),
        ("fc3", 64, 1),
    ]
    params = {}
    for name, fan_in, fan_out in dims:
        key, kw, kb = jax.random.split(key, 3)
        bound = 1.0 / float(fan_in) ** 0.5
        w = jax.random.uniform(kw, (fan_in, fan_out), jnp.float32, -bound, bound)
        b = jax.random.uniform(kb, (fan_out,), jnp.float32, -bound, bound)
        params[name] = (w, b)
    return params


def pack_params(params):
    """Pack into the kernel's argument order.  Weights -> bf16 (in,out);
    biases -> f32 (1,out).  fc1 weight split into eef-half / obj-half
    (concat elimination); fc3 weight transposed to (1, 64)."""
    bf16, f32 = jnp.bfloat16, jnp.float32

    def w(name):
        return params[name][0].astype(bf16)

    def b(name):
        return params[name][1].reshape(1, -1).astype(f32)

    w_fc1 = params["fc1"][0]
    return [
        w("obj_fc1"), b("obj_fc1"),
        w("obj_fc2"), b("obj_fc2"),
        w("eef_fc1"), b("eef_fc1"),
        w("eef_fc2"), b("eef_fc2"),
        w_fc1[:128].astype(bf16), w_fc1[128:].astype(bf16), b("fc1"),
        w("fc2"), b("fc2"),
        params["fc3"][0].T.astype(bf16),                 # (1, 64)
        params["fc3"][1].reshape(1, 1).astype(f32),
    ]


def reward_net_forward_batched(ee_traj_i, obj_emb_i, ee_traj_j, obj_emb_j, packed):
    """Batched forward over B trajectory pairs.

    ee_traj_*: (B, T, 3) f32, obj_emb_*: (B, T, 256) f32.
    Returns (logits (B, 2) f32, sum_abs_rewards (B,) f32).
    """
    B, T, _ = ee_traj_i.shape
    assert (2 * T) % 8 == 0, "2*T must be a multiple of 8 (sublane alignment)"
    rows = 2 * T
    bf16 = jnp.bfloat16

    # Per pair: stack trajectory i then trajectory j along the row axis, then
    # flatten pairs -> row block [p*2T, (p+1)*2T) belongs to pair p.
    eef = jnp.concatenate([ee_traj_i, ee_traj_j], axis=1).reshape(B * rows, 3).astype(bf16)
    obj = jnp.concatenate([obj_emb_i, obj_emb_j], axis=1).reshape(B * rows, 256).astype(bf16)

    # Activations index on the pair axis; every weight/bias uses a constant
    # index_map so it is DMA'd once and stays resident in VMEM across the grid.
    # TODO(synk): for very large training batches, pack multiple pairs per grid
    # step (>=512 rows/block) with a segmented epilogue reduce to amortize the
    # ~0.35us per-step overhead further.
    act_specs = [
        pl.BlockSpec((rows, 3), lambda p: (p, 0)),
        pl.BlockSpec((rows, 256), lambda p: (p, 0)),
    ]
    weight_specs = [pl.BlockSpec(arr.shape, lambda p: (0, 0)) for arr in packed]

    out = pl.pallas_call(
        _reward_pair_kernel,
        out_shape=jax.ShapeDtypeStruct((B, 1, 4), jnp.float32),
        grid=(B,),
        in_specs=act_specs + weight_specs,
        out_specs=pl.BlockSpec((1, 1, 4), lambda p: (p, 0, 0)),
        compiler_params=pltpu.CompilerParams(
            # Pair axis is embarrassingly parallel -> shards across both
            # TensorCores on v7x (no effect on single-TC v5e / v6e).
            dimension_semantics=("parallel",)),
    )(eef, obj, *packed)

    out = out.reshape(B, 4)
    logits = out[:, 0:2]              # [cum_r_i, cum_r_j] per pair
    sum_abs = out[:, 2] + out[:, 3]   # abs_r_i + abs_r_j per pair
    return logits, sum_abs


def reward_net_forward(ee_traj_i, obj_emb_i, ee_traj_j, obj_emb_j, packed):
    """Module-equivalent forward for a single pair: (logits (2,), scalar)."""
    logits, sum_abs = reward_net_forward_batched(
        ee_traj_i[None], obj_emb_i[None], ee_traj_j[None], obj_emb_j[None], packed)
    return logits[0], sum_abs[0]


# ------------------------- pure-JAX references -------------------------

def _lin_bf16(params, name, x):
    # Mimics the kernel's precision: bf16 weights & bf16-cast activations,
    # f32 accumulation, f32 bias add.
    w, b = params[name]
    return jnp.dot(x.astype(jnp.bfloat16), w.astype(jnp.bfloat16),
                   preferred_element_type=jnp.float32) + b


def _lin_f32(params, name, x):
    w, b = params[name]
    return x @ w + b


def _reference_forward_batched(ee_i, obj_i, ee_j, obj_j, params, lin):
    def cum(eef, obj):
        o = _leaky_relu(lin(params, "obj_fc1", obj))
        o = _leaky_relu(lin(params, "obj_fc2", o))
        e = _leaky_relu(lin(params, "eef_fc1", eef))
        e = _leaky_relu(lin(params, "eef_fc2", e))
        x = jnp.concatenate([e, o], axis=-1)
        x = _leaky_relu(lin(params, "fc1", x))
        x = _leaky_relu(lin(params, "fc2", x))
        r = lin(params, "fc3", x)
        return jnp.sum(r), jnp.sum(jnp.abs(r))

    def pair(ei, oi, ej, oj):
        ri, ai = cum(ei, oi)
        rj, aj = cum(ej, oj)
        return jnp.stack([ri, rj]), ai + aj

    return jax.vmap(pair)(ee_i, obj_i, ee_j, obj_j)


if __name__ == "__main__":
    root = jax.random.PRNGKey(0)
    kp, k1, k2, k3, k4 = jax.random.split(root, 5)

    B, T = 4, 8   # 4 trajectory pairs, 8 states per trajectory
    ee_i = jax.random.normal(k1, (B, T, 3), jnp.float32)
    obj_i = jax.random.normal(k2, (B, T, 256), jnp.float32)
    ee_j = jax.random.normal(k3, (B, T, 3), jnp.float32)
    obj_j = jax.random.normal(k4, (B, T, 256), jnp.float32)

    params = init_params(kp)
    packed = pack_params(params)

    fwd = jax.jit(reward_net_forward_batched)
    logits, sum_abs = jax.block_until_ready(fwd(ee_i, obj_i, ee_j, obj_j, packed))
    assert logits.shape == (B, 2) and sum_abs.shape == (B,)

    # Precision-matched (bf16 weights) reference: tight tolerance.
    ref_logits, ref_abs = _reference_forward_batched(ee_i, obj_i, ee_j, obj_j, params, _lin_bf16)
    assert jnp.allclose(logits, ref_logits, rtol=1e-3, atol=1e-4)
    assert jnp.allclose(sum_abs, ref_abs, rtol=1e-3, atol=1e-4)

    # Sanity check against the original full-f32 math (bf16 weights -> loose tol).
    f32_logits, f32_abs = _reference_forward_batched(ee_i, obj_i, ee_j, obj_j, params, _lin_f32)
    assert jnp.allclose(logits, f32_logits, rtol=0.2, atol=0.05)
    assert jnp.allclose(sum_abs, f32_abs, rtol=0.2, atol=0.05)

    # Module-signature single-pair path must match the batched pair 0.
    l0, a0 = jax.block_until_ready(
        reward_net_forward(ee_i[0], obj_i[0], ee_j[0], obj_j[0], packed))
    assert l0.shape == (2,)
    assert jnp.allclose(l0, logits[0], rtol=1e-3, atol=1e-4)
    assert jnp.allclose(a0, sum_abs[0], rtol=1e-3, atol=1e-4)

    print("KERNEL_OK")
</pallas_src>

<mosaic_0001>
module attributes {stable_mosaic.version = 11 : i64} {
  func.func @_reward_pair_kernel(%arg0: i32, %arg1: memref<16x3xbf16, #tpu.memory_space<vmem>>, %arg2: memref<16x256xbf16, #tpu.memory_space<vmem>>, %arg3: memref<256x128xbf16, #tpu.memory_space<vmem>>, %arg4: memref<1x128xf32, #tpu.memory_space<vmem>>, %arg5: memref<128x128xbf16, #tpu.memory_space<vmem>>, %arg6: memref<1x128xf32, #tpu.memory_space<vmem>>, %arg7: memref<3x128xbf16, #tpu.memory_space<vmem>>, %arg8: memref<1x128xf32, #tpu.memory_space<vmem>>, %arg9: memref<128x128xbf16, #tpu.memory_space<vmem>>, %arg10: memref<1x128xf32, #tpu.memory_space<vmem>>, %arg11: memref<128x128xbf16, #tpu.memory_space<vmem>>, %arg12: memref<128x128xbf16, #tpu.memory_space<vmem>>, %arg13: memref<1x128xf32, #tpu.memory_space<vmem>>, %arg14: memref<128x64xbf16, #tpu.memory_space<vmem>>, %arg15: memref<1x64xf32, #tpu.memory_space<vmem>>, %arg16: memref<1x64xbf16, #tpu.memory_space<vmem>>, %arg17: memref<1x1xf32, #tpu.memory_space<vmem>>, %arg18: memref<1x1x4xf32, #tpu.memory_space<vmem>>) attributes {dimension_semantics = [#tpu.dimension_semantics<parallel>], iteration_bounds = array<i64: 4>, scalar_prefetch = 0 : i64, scratch_operands = 0 : i64, tpu.core_type = #tpu.core_type<tc>, window_params = [{transform_indices = @transform_0, window_bounds = array<i64: 16, 3>}, {transform_indices = @transform_1, window_bounds = array<i64: 16, 256>}, {pipeline_mode = #tpu.pipeline_mode<synchronous>, transform_indices = @transform_2, window_bounds = array<i64: 256, 128>}, {pipeline_mode = #tpu.pipeline_mode<synchronous>, transform_indices = @transform_3, window_bounds = array<i64: 1, 128>}, {pipeline_mode = #tpu.pipeline_mode<synchronous>, transform_indices = @transform_4, window_bounds = array<i64: 128, 128>}, {pipeline_mode = #tpu.pipeline_mode<synchronous>, transform_indices = @transform_5, window_bounds = array<i64: 1, 128>}, {pipeline_mode = #tpu.pipeline_mode<synchronous>, transform_indices = @transform_6, window_bounds = array<i64: 3, 128>}, {pipeline_mode = #tpu.pipeline_mode<synchronous>, transform_indices = @transform_7, window_bounds = array<i64: 1, 128>}, {pipeline_mode = #tpu.pipeline_mode<synchronous>, transform_indices = @transform_8, window_bounds = array<i64: 128, 128>}, {pipeline_mode = #tpu.pipeline_mode<synchronous>, transform_indices = @transform_9, window_bounds = array<i64: 1, 128>}, {pipeline_mode = #tpu.pipeline_mode<synchronous>, transform_indices = @transform_10, window_bounds = array<i64: 128, 128>}, {pipeline_mode = #tpu.pipeline_mode<synchronous>, transform_indices = @transform_11, window_bounds = array<i64: 128, 128>}, {pipeline_mode = #tpu.pipeline_mode<synchronous>, transform_indices = @transform_12, window_bounds = array<i64: 1, 128>}, {pipeline_mode = #tpu.pipeline_mode<synchronous>, transform_indices = @transform_13, window_bounds = array<i64: 128, 64>}, {pipeline_mode = #tpu.pipeline_mode<synchronous>, transform_indices = @transform_14, window_bounds = array<i64: 1, 64>}, {pipeline_mode = #tpu.pipeline_mode<synchronous>, transform_indices = @transform_15, window_bounds = array<i64: 1, 64>}, {pipeline_mode = #tpu.pipeline_mode<synchronous>, transform_indices = @transform_16, window_bounds = array<i64: 1, 1>}, {transform_indices = @transform_17, window_bounds = array<i64: 1, 1, 4>}]} {
    %c0 = arith.constant 0 : index
    %c0_0 = arith.constant 0 : index
    %0 = vector.load %arg2[%c0, %c0_0] : memref<16x256xbf16, #tpu.memory_space<vmem>>, vector<16x256xbf16>
    %c0_1 = arith.constant 0 : index
    %c0_2 = arith.constant 0 : index
    %1 = vector.load %arg3[%c0_1, %c0_2] : memref<256x128xbf16, #tpu.memory_space<vmem>>, vector<256x128xbf16>
    %cst = arith.constant dense<0.000000e+00> : vector<16x128xf32>
    %2 = tpu.matmul %0, %1, %cst {dimension_numbers = #tpu.dot_dimension_numbers<[1], [0], [0], [1], [0, 0, 1, 1], [], []>} : vector<16x256xbf16>, vector<256x128xbf16>, vector<16x128xf32> -> vector<16x128xf32>
    %c0_3 = arith.constant 0 : index
    %c0_4 = arith.constant 0 : index
    %3 = vector.load %arg4[%c0_3, %c0_4] : memref<1x128xf32, #tpu.memory_space<vmem>>, vector<1x128xf32>
    %4 = vector.broadcast %3 : vector<1x128xf32> to vector<16x128xf32>
    %5 = arith.addf %2, %4 : vector<16x128xf32>
    %cst_5 = arith.constant 0.000000e+00 : f32
    %6 = vector.broadcast %cst_5 : f32 to vector<16x128xf32>
    %7 = arith.cmpf oge, %5, %6 : vector<16x128xf32>
    %cst_6 = arith.constant 0.00999999977 : f32
    %8 = vector.broadcast %cst_6 : f32 to vector<16x128xf32>
    %9 = arith.mulf %8, %5 : vector<16x128xf32>
    %10 = arith.select %7, %5, %9 : vector<16x128xi1>, vector<16x128xf32>
    %11 = arith.truncf %10 : vector<16x128xf32> to vector<16x128xbf16>
    %c0_7 = arith.constant 0 : index
    %c0_8 = arith.constant 0 : index
    %12 = vector.load %arg5[%c0_7, %c0_8] : memref<128x128xbf16, #tpu.memory_space<vmem>>, vector<128x128xbf16>
    %cst_9 = arith.constant dense<0.000000e+00> : vector<16x128xf32>
    %13 = tpu.matmul %11, %12, %cst_9 {dimension_numbers = #tpu.dot_dimension_numbers<[1], [0], [0], [1], [0, 0, 1, 1], [], []>} : vector<16x128xbf16>, vector<128x128xbf16>, vector<16x128xf32> -> vector<16x128xf32>
    %c0_10 = arith.constant 0 : index
    %c0_11 = arith.constant 0 : index
    %14 = vector.load %arg6[%c0_10, %c0_11] : memref<1x128xf32, #tpu.memory_space<vmem>>, vector<1x128xf32>
    %15 = vector.broadcast %14 : vector<1x128xf32> to vector<16x128xf32>
    %16 = arith.addf %13, %15 : vector<16x128xf32>
    %cst_12 = arith.constant 0.000000e+00 : f32
    %17 = vector.broadcast %cst_12 : f32 to vector<16x128xf32>
    %18 = arith.cmpf oge, %16, %17 : vector<16x128xf32>
    %cst_13 = arith.constant 0.00999999977 : f32
    %19 = vector.broadcast %cst_13 : f32 to vector<16x128xf32>
    %20 = arith.mulf %19, %16 : vector<16x128xf32>
    %21 = arith.select %18, %16, %20 : vector<16x128xi1>, vector<16x128xf32>
    %c0_14 = arith.constant 0 : index
    %c0_15 = arith.constant 0 : index
    %22 = vector.load %arg1[%c0_14, %c0_15] : memref<16x3xbf16, #tpu.memory_space<vmem>>, vector<16x3xbf16>
    %23 = arith.extf %22 : vector<16x3xbf16> to vector<16x3xf32>
    %c0_16 = arith.constant 0 : index
    %c0_17 = arith.constant 0 : index
    %24 = vector.load %arg7[%c0_16, %c0_17] : memref<3x128xbf16, #tpu.memory_space<vmem>>, vector<3x128xbf16>
    %25 = arith.extf %24 : vector<3x128xbf16> to vector<3x128xf32>
    %26 = vector.extract_strided_slice %23 {offsets = [0, 0], sizes = [16, 1], strides = [1, 1]} : vector<16x3xf32> to vector<16x1xf32>
    %27 = vector.extract_strided_slice %25 {offsets = [0, 0], sizes = [1, 128], strides = [1, 1]} : vector<3x128xf32> to vector<1x128xf32>
    %28 = vector.broadcast %26 : vector<16x1xf32> to vector<16x128xf32>
    %29 = vector.broadcast %27 : vector<1x128xf32> to vector<16x128xf32>
    %30 = arith.mulf %28, %29 : vector<16x128xf32>
    %31 = vector.extract_strided_slice %23 {offsets = [0, 1], sizes = [16, 1], strides = [1, 1]} : vector<16x3xf32> to vector<16x1xf32>
    %32 = vector.extract_strided_slice %25 {offsets = [1, 0], sizes = [1, 128], strides = [1, 1]} : vector<3x128xf32> to vector<1x128xf32>
    %33 = vector.broadcast %31 : vector<16x1xf32> to vector<16x128xf32>
    %34 = vector.broadcast %32 : vector<1x128xf32> to vector<16x128xf32>
    %35 = arith.mulf %33, %34 : vector<16x128xf32>
    %36 = arith.addf %30, %35 : vector<16x128xf32>
    %37 = vector.extract_strided_slice %23 {offsets = [0, 2], sizes = [16, 1], strides = [1, 1]} : vector<16x3xf32> to vector<16x1xf32>
    %38 = vector.extract_strided_slice %25 {offsets = [2, 0], sizes = [1, 128], strides = [1, 1]} : vector<3x128xf32> to vector<1x128xf32>
    %39 = vector.broadcast %37 : vector<16x1xf32> to vector<16x128xf32>
    %40 = vector.broadcast %38 : vector<1x128xf32> to vector<16x128xf32>
    %41 = arith.mulf %39, %40 : vector<16x128xf32>
    %42 = arith.addf %36, %41 : vector<16x128xf32>
    %c0_18 = arith.constant 0 : index
    %c0_19 = arith.constant 0 : index
    %43 = vector.load %arg8[%c0_18, %c0_19] : memref<1x128xf32, #tpu.memory_space<vmem>>, vector<1x128xf32>
    %44 = vector.broadcast %43 : vector<1x128xf32> to vector<16x128xf32>
    %45 = arith.addf %42, %44 : vector<16x128xf32>
    %cst_20 = arith.constant 0.000000e+00 : f32
    %46 = vector.broadcast %cst_20 : f32 to vector<16x128xf32>
    %47 = arith.cmpf oge, %45, %46 : vector<16x128xf32>
    %cst_21 = arith.constant 0.00999999977 : f32
    %48 = vector.broadcast %cst_21 : f32 to vector<16x128xf32>
    %49 = arith.mulf %48, %45 : vector<16x128xf32>
    %50 = arith.select %47, %45, %49 : vector<16x128xi1>, vector<16x128xf32>
    %51 = arith.truncf %50 : vector<16x128xf32> to vector<16x128xbf16>
    %c0_22 = arith.constant 0 : index
    %c0_23 = arith.constant 0 : index
    %52 = vector.load %arg9[%c0_22, %c0_23] : memref<128x128xbf16, #tpu.memory_space<vmem>>, vector<128x128xbf16>
    %cst_24 = arith.constant dense<0.000000e+00> : vector<16x128xf32>
    %53 = tpu.matmul %51, %52, %cst_24 {dimension_numbers = #tpu.dot_dimension_numbers<[1], [0], [0], [1], [0, 0, 1, 1], [], []>} : vector<16x128xbf16>, vector<128x128xbf16>, vector<16x128xf32> -> vector<16x128xf32>
    %c0_25 = arith.constant 0 : index
    %c0_26 = arith.constant 0 : index
    %54 = vector.load %arg10[%c0_25, %c0_26] : memref<1x128xf32, #tpu.memory_space<vmem>>, vector<1x128xf32>
    %55 = vector.broadcast %54 : vector<1x128xf32> to vector<16x128xf32>
    %56 = arith.addf %53, %55 : vector<16x128xf32>
    %cst_27 = arith.constant 0.000000e+00 : f32
    %57 = vector.broadcast %cst_27 : f32 to vector<16x128xf32>
    %58 = arith.cmpf oge, %56, %57 : vector<16x128xf32>
    %cst_28 = arith.constant 0.00999999977 : f32
    %59 = vector.broadcast %cst_28 : f32 to vector<16x128xf32>
    %60 = arith.mulf %59, %56 : vector<16x128xf32>
    %61 = arith.select %58, %56, %60 : vector<16x128xi1>, vector<16x128xf32>
    %62 = arith.truncf %61 : vector<16x128xf32> to vector<16x128xbf16>
    %c0_29 = arith.constant 0 : index
    %c0_30 = arith.constant 0 : index
    %63 = vector.load %arg11[%c0_29, %c0_30] : memref<128x128xbf16, #tpu.memory_space<vmem>>, vector<128x128xbf16>
    %cst_31 = arith.constant dense<0.000000e+00> : vector<16x128xf32>
    %64 = tpu.matmul %62, %63, %cst_31 {dimension_numbers = #tpu.dot_dimension_numbers<[1], [0], [0], [1], [0, 0, 1, 1], [], []>} : vector<16x128xbf16>, vector<128x128xbf16>, vector<16x128xf32> -> vector<16x128xf32>
    %65 = arith.truncf %21 : vector<16x128xf32> to vector<16x128xbf16>
    %c0_32 = arith.constant 0 : index
    %c0_33 = arith.constant 0 : index
    %66 = vector.load %arg12[%c0_32, %c0_33] : memref<128x128xbf16, #tpu.memory_space<vmem>>, vector<128x128xbf16>
    %cst_34 = arith.constant dense<0.000000e+00> : vector<16x128xf32>
    %67 = tpu.matmul %65, %66, %cst_34 {dimension_numbers = #tpu.dot_dimension_numbers<[1], [0], [0], [1], [0, 0, 1, 1], [], []>} : vector<16x128xbf16>, vector<128x128xbf16>, vector<16x128xf32> -> vector<16x128xf32>
    %68 = arith.addf %64, %67 : vector<16x128xf32>
    %c0_35 = arith.constant 0 : index
    %c0_36 = arith.constant 0 : index
    %69 = vector.load %arg13[%c0_35, %c0_36] : memref<1x128xf32, #tpu.memory_space<vmem>>, vector<1x128xf32>
    %70 = vector.broadcast %69 : vector<1x128xf32> to vector<16x128xf32>
    %71 = arith.addf %68, %70 : vector<16x128xf32>
    %cst_37 = arith.constant 0.000000e+00 : f32
    %72 = vector.broadcast %cst_37 : f32 to vector<16x128xf32>
    %73 = arith.cmpf oge, %71, %72 : vector<16x128xf32>
    %cst_38 = arith.constant 0.00999999977 : f32
    %74 = vector.broadcast %cst_38 : f32 to vector<16x128xf32>
    %75 = arith.mulf %74, %71 : vector<16x128xf32>
    %76 = arith.select %73, %71, %75 : vector<16x128xi1>, vector<16x128xf32>
    %77 = arith.truncf %76 : vector<16x128xf32> to vector<16x128xbf16>
    %c0_39 = arith.constant 0 : index
    %c0_40 = arith.constant 0 : index
    %78 = vector.load %arg14[%c0_39, %c0_40] : memref<128x64xbf16, #tpu.memory_space<vmem>>, vector<128x64xbf16>
    %cst_41 = arith.constant dense<0.000000e+00> : vector<16x64xf32>
    %79 = tpu.matmul %77, %78, %cst_41 {dimension_numbers = #tpu.dot_dimension_numbers<[1], [0], [0], [1], [0, 0, 1, 1], [], []>} : vector<16x128xbf16>, vector<128x64xbf16>, vector<16x64xf32> -> vector<16x64xf32>
    %c0_42 = arith.constant 0 : index
    %c0_43 = arith.constant 0 : index
    %80 = vector.load %arg15[%c0_42, %c0_43] : memref<1x64xf32, #tpu.memory_space<vmem>>, vector<1x64xf32>
    %81 = vector.broadcast %80 : vector<1x64xf32> to vector<16x64xf32>
    %82 = arith.addf %79, %81 : vector<16x64xf32>
    %cst_44 = arith.constant 0.000000e+00 : f32
    %83 = vector.broadcast %cst_44 : f32 to vector<16x64xf32>
    %84 = arith.cmpf oge, %82, %83 : vector<16x64xf32>
    %cst_45 = arith.constant 0.00999999977 : f32
    %85 = vector.broadcast %cst_45 : f32 to vector<16x64xf32>
    %86 = arith.mulf %85, %82 : vector<16x64xf32>
    %87 = arith.select %84, %82, %86 : vector<16x64xi1>, vector<16x64xf32>
    %88 = arith.truncf %87 : vector<16x64xf32> to vector<16x64xbf16>
    %89 = arith.extf %88 : vector<16x64xbf16> to vector<16x64xf32>
    %c0_46 = arith.constant 0 : index
    %c0_47 = arith.constant 0 : index
    %90 = vector.load %arg16[%c0_46, %c0_47] : memref<1x64xbf16, #tpu.memory_space<vmem>>, vector<1x64xbf16>
    %91 = arith.extf %90 : vector<1x64xbf16> to vector<1x64xf32>
    %92 = vector.broadcast %91 : vector<1x64xf32> to vector<16x64xf32>
    %93 = arith.mulf %89, %92 : vector<16x64xf32>
    %cst_48 = arith.constant dense<0.000000e+00> : vector<16xf32>
    %94 = vector.multi_reduction <add>, %93, %cst_48 [1] : vector<16x64xf32> to vector<16xf32>
    %95 = vector.shape_cast %94 : vector<16xf32> to vector<16x1xf32>
    %c0_49 = arith.constant 0 : index
    %c0_50 = arith.constant 0 : index
    %96 = vector.load %arg17[%c0_49, %c0_50] : memref<1x1xf32, #tpu.memory_space<vmem>>, vector<1x1xf32>
    %97 = vector.broadcast %96 : vector<1x1xf32> to vector<16x1xf32>
    %98 = arith.addf %95, %97 : vector<16x1xf32>
    %99 = math.absf %98 : vector<16x1xf32>
    %100 = vector.extract_strided_slice %98 {offsets = [0, 0], sizes = [8, 1], strides = [1, 1]} : vector<16x1xf32> to vector<8x1xf32>
    %101 = vector.shape_cast %100 : vector<8x1xf32> to vector<1x8x1xf32>
    %cst_51 = arith.constant dense<0.000000e+00> : vector<1xf32>
    %102 = vector.multi_reduction <add>, %101, %cst_51 [1, 2] : vector<1x8x1xf32> to vector<1xf32>
    %103 = vector.shape_cast %102 : vector<1xf32> to vector<1x1x1xf32>
    %104 = vector.extract %103[0, 0, 0] : f32 from vector<1x1x1xf32>
    %105 = vector.broadcast %104 : f32 to vector<1x1xf32>
    %106 = vector.extract_strided_slice %98 {offsets = [8, 0], sizes = [8, 1], strides = [1, 1]} : vector<16x1xf32> to vector<8x1xf32>
    %107 = vector.shape_cast %106 : vector<8x1xf32> to vector<1x8x1xf32>
    %cst_52 = arith.constant dense<0.000000e+00> : vector<1xf32>
    %108 = vector.multi_reduction <add>, %107, %cst_52 [1, 2] : vector<1x8x1xf32> to vector<1xf32>
    %109 = vector.shape_cast %108 : vector<1xf32> to vector<1x1x1xf32>
    %110 = vector.extract %109[0, 0, 0] : f32 from vector<1x1x1xf32>
    %111 = vector.broadcast %110 : f32 to vector<1x1xf32>
    %112 = vector.extract_strided_slice %99 {offsets = [0, 0], sizes = [8, 1], strides = [1, 1]} : vector<16x1xf32> to vector<8x1xf32>
    %113 = vector.shape_cast %112 : vector<8x1xf32> to vector<1x8x1xf32>
    %cst_53 = arith.constant dense<0.000000e+00> : vector<1xf32>
    %114 = vector.multi_reduction <add>, %113, %cst_53 [1, 2] : vector<1x8x1xf32> to vector<1xf32>
    %115 = vector.shape_cast %114 : vector<1xf32> to vector<1x1x1xf32>
    %116 = vector.extract %115[0, 0, 0] : f32 from vector<1x1x1xf32>
    %117 = vector.broadcast %116 : f32 to vector<1x1xf32>
    %118 = vector.extract_strided_slice %99 {offsets = [8, 0], sizes = [8, 1], strides = [1, 1]} : vector<16x1xf32> to vector<8x1xf32>
    %119 = vector.shape_cast %118 : vector<8x1xf32> to vector<1x8x1xf32>
    %cst_54 = arith.constant dense<0.000000e+00> : vector<1xf32>
    %120 = vector.multi_reduction <add>, %119, %cst_54 [1, 2] : vector<1x8x1xf32> to vector<1xf32>
    %121 = vector.shape_cast %120 : vector<1xf32> to vector<1x1x1xf32>
    %122 = vector.extract %121[0, 0, 0] : f32 from vector<1x1x1xf32>
    %123 = vector.broadcast %122 : f32 to vector<1x1xf32>
    %124 = tpu.concatenate %105, %111, %117, %123 in 1 : vector<1x1xf32>, vector<1x1xf32>, vector<1x1xf32>, vector<1x1xf32> -> vector<1x4xf32>
    %125 = vector.shape_cast %124 : vector<1x4xf32> to vector<1x1x4xf32>
    %c0_55 = arith.constant 0 : index
    %c0_56 = arith.constant 0 : index
    %c0_57 = arith.constant 0 : index
    %126 = vector.load %arg18[%c0_55, %c0_56, %c0_57] : memref<1x1x4xf32, #tpu.memory_space<vmem>>, vector<1x1x4xf32>
    tpu.vector_store %arg18[%c0_55, %c0_56, %c0_57], %125 {strides = array<i32>} : memref<1x1x4xf32, #tpu.memory_space<vmem>>, vector<1x1x4xf32>,
    return
  }
  func.func @transform_0(%arg0: i32) -> (i32, i32) {
    %c0_i32 = arith.constant 0 : i32
    %c0_i32_0 = arith.constant 0 : i32
    return %arg0, %c0_i32 : i32, i32
  }
  func.func @transform_1(%arg0: i32) -> (i32, i32) {
    %c0_i32 = arith.constant 0 : i32
    %c0_i32_0 = arith.constant 0 : i32
    return %arg0, %c0_i32 : i32, i32
  }
  func.func @transform_2(%arg0: i32) -> (i32, i32) {
    %c0_i32 = arith.constant 0 : i32
    %c0_i32_0 = arith.constant 0 : i32
    %c0_i32_1 = arith.constant 0 : i32
    return %c0_i32, %c0_i32_0 : i32, i32
  }
  func.func @transform_3(%arg0: i32) -> (i32, i32) {
    %c0_i32 = arith.constant 0 : i32
    %c0_i32_0 = arith.constant 0 : i32
    %c0_i32_1 = arith.constant 0 : i32
    return %c0_i32, %c0_i32_0 : i32, i32
  }
  func.func @transform_4(%arg0: i32) -> (i32, i32) {
    %c0_i32 = arith.constant 0 : i32
    %c0_i32_0 = arith.constant 0 : i32
    %c0_i32_1 = arith.constant 0 : i32
    return %c0_i32, %c0_i32_0 : i32, i32
  }
  func.func @transform_5(%arg0: i32) -> (i32, i32) {
    %c0_i32 = arith.constant 0 : i32
    %c0_i32_0 = arith.constant 0 : i32
    %c0_i32_1 = arith.constant 0 : i32
    return %c0_i32, %c0_i32_0 : i32, i32
  }
  func.func @transform_6(%arg0: i32) -> (i32, i32) {
    %c0_i32 = arith.constant 0 : i32
    %c0_i32_0 = arith.constant 0 : i32
    %c0_i32_1 = arith.constant 0 : i32
    return %c0_i32, %c0_i32_0 : i32, i32
  }
  func.func @transform_7(%arg0: i32) -> (i32, i32) {
    %c0_i32 = arith.constant 0 : i32
    %c0_i32_0 = arith.constant 0 : i32
    %c0_i32_1 = arith.constant 0 : i32
    return %c0_i32, %c0_i32_0 : i32, i32
  }
  func.func @transform_8(%arg0: i32) -> (i32, i32) {
    %c0_i32 = arith.constant 0 : i32
    %c0_i32_0 = arith.constant 0 : i32
    %c0_i32_1 = arith.constant 0 : i32
    return %c0_i32, %c0_i32_0 : i32, i32
  }
  func.func @transform_9(%arg0: i32) -> (i32, i32) {
    %c0_i32 = arith.constant 0 : i32
    %c0_i32_0 = arith.constant 0 : i32
    %c0_i32_1 = arith.constant 0 : i32
    return %c0_i32, %c0_i32_0 : i32, i32
  }
  func.func @transform_10(%arg0: i32) -> (i32, i32) {
    %c0_i32 = arith.constant 0 : i32
    %c0_i32_0 = arith.constant 0 : i32
    %c0_i32_1 = arith.constant 0 : i32
    return %c0_i32, %c0_i32_0 : i32, i32
  }
  func.func @transform_11(%arg0: i32) -> (i32, i32) {
    %c0_i32 = arith.constant 0 : i32
    %c0_i32_0 = arith.constant 0 : i32
    %c0_i32_1 = arith.constant 0 : i32
    return %c0_i32, %c0_i32_0 : i32, i32
  }
  func.func @transform_12(%arg0: i32) -> (i32, i32) {
    %c0_i32 = arith.constant 0 : i32
    %c0_i32_0 = arith.constant 0 : i32
    %c0_i32_1 = arith.constant 0 : i32
    return %c0_i32, %c0_i32_0 : i32, i32
  }
  func.func @transform_13(%arg0: i32) -> (i32, i32) {
    %c0_i32 = arith.constant 0 : i32
    %c0_i32_0 = arith.constant 0 : i32
    %c0_i32_1 = arith.constant 0 : i32
    return %c0_i32, %c0_i32_0 : i32, i32
  }
  func.func @transform_14(%arg0: i32) -> (i32, i32) {
    %c0_i32 = arith.constant 0 : i32
    %c0_i32_0 = arith.constant 0 : i32
    %c0_i32_1 = arith.constant 0 : i32
    return %c0_i32, %c0_i32_0 : i32, i32
  }
  func.func @transform_15(%arg0: i32) -> (i32, i32) {
    %c0_i32 = arith.constant 0 : i32
    %c0_i32_0 = arith.constant 0 : i32
    %c0_i32_1 = arith.constant 0 : i32
    return %c0_i32, %c0_i32_0 : i32, i32
  }
  func.func @transform_16(%arg0: i32) -> (i32, i32) {
    %c0_i32 = arith.constant 0 : i32
    %c0_i32_0 = arith.constant 0 : i32
    %c0_i32_1 = arith.constant 0 : i32
    return %c0_i32, %c0_i32_0 : i32, i32
  }
  func.func @transform_17(%arg0: i32) -> (i32, i32, i32) {
    %c0_i32 = arith.constant 0 : i32
    %c0_i32_0 = arith.constant 0 : i32
    %c0_i32_1 = arith.constant 0 : i32
    return %arg0, %c0_i32, %c0_i32_0 : i32, i32, i32
  }
}

</mosaic_0001>

<bundles_post_ra>
// kernel: reward_net_forward_batched.1
= control target key start
LH: loop header
LB: loop body
LE: loop exit
PB: predicated region body
PF: predicated region fallthrough
CT: control target
= control target key end

     0   :  { %s2502_s0 = inlined_call_operand.vmem [shape: bf16[64,3], index: 0, kind: input, shape index: {}]   ;;  %s2503_s1 = inlined_call_operand.vmem [shape: bf16[64,256], index: 1, kind: input, shape index: {}]   ;;  %s2504_s2 = inlined_call_operand.vmem [shape: bf16[256,128], index: 2, kind: input, shape index: {}]   ;;  %s2505_s3 = inlined_call_operand.vmem [shape: f32[1,128], index: 3, kind: input, shape index: {}]   ;;  %s2506_s4 = inlined_call_operand.vmem [shape: bf16[128,128], index: 4, kind: input, shape index: {}]   ;;  %s2507_s5 = inlined_call_operand.hbm [shape: f32[1,128], index: 5, kind: input, shape index: {}]   ;;  %s2508_s6 = inlined_call_operand.hbm [shape: bf16[3,128], index: 6, kind: input, shape index: {}]   ;;  %s2509_s7 = inlined_call_operand.vmem [shape: f32[1,128], index: 7, kind: input, shape index: {}]   ;;  %s2510_s8 = inlined_call_operand.vmem [shape: bf16[128,128], index: 8, kind: input, shape index: {}]   ;;  %s2511_s9 = inlined_call_operand.vmem [shape: f32[1,128], index: 9, kind: input, shape index: {}]   ;;  %s2512_s10 = inlined_call_operand.vmem [shape: bf16[128,128], index: 10, kind: input, shape index: {}]   ;;  %s2513_s11 = inlined_call_operand.vmem [shape: bf16[128,128], index: 11, kind: input, shape index: {}]   ;;  %s2514_s12 = inlined_call_operand.vmem [shape: f32[1,128], index: 12, kind: input, shape index: {}]   ;;  %s2515_s13 = inlined_call_operand.vmem [shape: bf16[128,64], index: 13, kind: input, shape index: {}]   ;;  %s2516_s14 = inlined_call_operand.vmem [shape: f32[1,64], index: 14, kind: input, shape index: {}]   ;;  %s2517_s15 = inlined_call_operand.vmem [shape: bf16[1,64], index: 15, kind: input, shape index: {}]   ;;  %s2518_s16 = inlined_call_operand.<no memory space> [shape: f32[1,1], index: 16, kind: input, shape index: {}]   ;;  %s2519_s17 = inlined_call_operand.vmem [shape: f32[4,1,4], index: 17, kind: output, shape index: {}]  }
   0x1   :  { %2523 = sst [smem:[#allocation10_spill]] %s2502_s0  ;;  %v22_v0 = vstv %s2518_s16 }
   0x2   :  { %2524 = sst [smem:[#allocation11_spill]] %s2503_s1  ;;  %23 = vst [vmem:[#allocation2] sm:$0x1] %v22_v0 }
   0x3   :  { %2525 = sst [smem:[#allocation12_spill]] %s2507_s5 }
   0x4   :  { %2526 = sst [smem:[#allocation13_spill]] %s2508_s6 }
   0x5   :  { %24 = vsyncpa [#allocation4], 0 }
   0x6   :  { %25 = vsyncpa [#allocation6], 0  ;;  %s2155_s26 = smov 0  }
   0x7 LB: > { %2527 = sst [smem:[#allocation9_spill]] %s2053_s26  ;;  %s2161_s27 = sadd.s32 4294967295, %s2053_s26   ;;  %s2053_s26 = sphi %s2155_s26, %s31_s26  }
   0x8   : > { %p1612_p0 = scmp.ge.s32.totalorder %s2053_s26, 1  ;;  %p429_p1 = scmp.lt.s32.totalorder %s2053_s26, 5 }
   0x9   : > { %p2520_p2 = scmp.eq.s32.totalorder %s2161_s27, 0  ;;  %s2055_s28 = smov [#allocation3]  }
   0xa   : > { %p2166_p3 = pnand %p1612_p0, %p429_p1  ;;  %s451_s29 = sshll.u32 %s2055_s28, 4  ;;  %s452_s29 = int_to_ptr.vmem [resolvable:$true] %s451_s29 }
   0xb   : > { %s2056_s0 = smov [#allocation5]   ;;  %s2530_s5 = sld [smem:[#allocation12_spill]] }
   0xc   : > { %s2528_s16 = scalar_select %p2166_p3, 1, 0 }
   0xd   : > { %p1879_p4 = pneg %p2166_p3  ;;  %s462_s30 = sshll.u32 %s2056_s0, 4  ;;  %s2178_s30 = int_to_ptr.vmem [resolvable:$true] %s462_s30 }
   0xf   : > { %p2174_p5 = pnand %p2520_p2, %p1879_p4 }
  0x11   : > { %s1983_s20 = scalar_lea.hbm %s2530_s5, 16  ;;  %p1985_p7 = pneg %p2174_p5 }
  0x12   : > { %p1984_p6 = scmp.ne.s32.totalorder %s2530_s5, %s1983_s20  ;;  %p1990_p10 = scmp.lt.u32.totalorder %s1983_s20, %s2530_s5 }
  0x14   : > { %p1986_p8 = pnand %p1985_p7, %p1984_p6 }
  0x16   : > { %p1987_p9 = pneg %p1986_p8 }
  0x18   : > { %p1992_p11 = pnand %p1990_p10, %p1987_p9 }
  0x1a   : > { %1995 = shalt.err (!%p1992_p11)
}
  0x1b   : > { %s1996_s25 = scalar_lea.vmem %s452_s29, 16  ;;  %s2003_s28 = scalar_lea.vmem %s452_s29, 32 }
  0x1c   : > { %p1997_p12 = scmp.ne.s32.totalorder %s452_s29, %s1996_s25  ;;  %p2004_p1 = scmp.lt.s32.totalorder %s452_s29, %s452_s29 }
  0x1d   : > { %p2005_p4 = scmp.lt.s32.totalorder %s2003_s28, %s1996_s25 }
  0x1e   : > { %p1999_p13 = pnand %p1997_p12, %p1985_p7 }
  0x1f   : > { %p2006_p2 = por %p2005_p4, %p2004_p1 }
  0x20   : > { %p2000_p0 = pneg %p1999_p13 }
  0x22   : > { %p2007_p3 = pnand %p2006_p2, %p2000_p0 }
  0x24   : > { %2010 = shalt.err (!%p2007_p3)
}
  0x25   : > { %1882 = dma.hbm_to_vmem [thread:$0]  (!%p2174_p5), %s2530_s5, 16, %s452_s29, [#allocation4]  }
  0x26   : > { %s2531_s6 = sld [smem:[#allocation13_spill]] }
  0x2c   : > { %s2011_s21 = scalar_lea.hbm %s2531_s6, 32 }
  0x2d   : > { %p2012_p6 = scmp.ne.s32.totalorder %s2531_s6, %s2011_s21  ;;  %p2018_p3 = scmp.lt.u32.totalorder %s2011_s21, %s2531_s6 }
  0x2f   : > { %p2014_p8 = pnand %p2012_p6, %p1985_p7 }
  0x31   : > { %p2015_p2 = pneg %p2014_p8 }
  0x33   : > { %p2020_p9 = pnand %p2018_p3, %p2015_p2 }
  0x35   : > { %2023 = shalt.err (!%p2020_p9)
}
  0x36   : > { %s2024_s29 = scalar_lea.vmem %s2178_s30, 32  ;;  %p2032_p13 = scmp.lt.s32.totalorder %s2178_s30, %s2178_s30 }
  0x37   : > { %p2025_p10 = scmp.ne.s32.totalorder %s2178_s30, %s2024_s29  ;;  %p2033_p0 = scmp.lt.s32.totalorder %s2024_s29, %s2024_s29 }
  0x39   : > { %p2027_p11 = pnand %p2025_p10, %p1985_p7  ;;  %p2034_p1 = por %p2033_p0, %p2032_p13 }
  0x3b   : > { %p2028_p12 = pneg %p2027_p11 }
  0x3d   : > { %p2035_p4 = pnand %p2034_p1, %p2028_p12 }
  0x3f   : > { %2038 = shalt.err (!%p2035_p4)
}
  0x40   : > { %1885 = dma.hbm_to_vmem [thread:$0]  (!%p2174_p5), %s2531_s6, 32, %s2178_s30, [#allocation6]  }
  0x41   : > { %p2532_p6 = scmp.ne.s32.totalorder %s2528_s16, 0 }
  0x42   : > { %p2533_p8 = scmp.eq.s32.totalorder (!%p2532_p6), %s2161_s27, 0 }
  0x43   : > { %524 = sbr.rel (%p2532_p6) target bundleno = 1364 (0x554), region = 88 }
  0x4a   : > { %2044 = dma.done.wait (%p2533_p8), [#allocation4], 16   ;;  %p2534_p7 = pmov %p2533_p8 }
  0x4c   : > { %2046 = vsyncadd (%p2534_p7), [#allocation4], 4294967280  ;;  %p2535_p2 = pmov %p2534_p7 }
  0x4e   : > { %2048 = dma.done.wait (%p2535_p2), [#allocation6], 32   ;;  %p2536_p3 = pmov %p2535_p2 }
  0x4f   : > { %v2057_v1 = vmov 0   ;;  %v2058_v2 = vmov 2   ;;  %v2059_v3 = vmov 0.0   ;;  %v1924_v4 = vld [vmem:[%s2504_s2 + $0x40] sm:$0xff]   ;;  %s1619_s18 = sshll.u32 %s2161_s27, 1  ;;  %v1926_v6 = vld [vmem:[%s2504_s2 + $0x48] sm:$0xff]   ;;  %v930_v43 = vlaneseq }
  0x50   : > { %2050 = vsyncadd (%p2536_p3), [#allocation6], 4294967264  ;;  %1905 = vset.pattern.permute.xlu0 %v2057_v1  ;;  %1917 = vset.pattern.permute.xlu1 %v2058_v2  ;;  %v1925_v5 = vld [vmem:[%s2504_s2] sm:$0xff]   ;;  %v1927_v7 = vld [vmem:[%s2504_s2 + $0x8] sm:$0xff]   ;;  %p585_p5 = scmp.lt.s32.totalorder %s1619_s18, 7  ;;  %s2537_s25 = sld [smem:[#allocation10_spill]] }
  0x51   : > { %1763 = vmatprep.subr.bf16.mxu1 %v2059_v3  ;;  %1696 = vmatprep.subr.bf16.mxu0 %v1924_v4  ;;  %v1928_v8 = vld [vmem:[%s2504_s2 + $0x50] sm:$0xff]   ;;  %v1930_v10 = vld [vmem:[%s2504_s2 + $0x58] sm:$0xff]   ;;  %v1932_v12 = vld [vmem:[%s2504_s2 + $0x60] sm:$0xff]   ;;  %s2538_s0 = sld [smem:[#allocation11_spill]]  ;;  %v2060_v26 = vmov 1   ;;  %vm2061_vm0 = vmmov 0  }
  0x52   : > { %1697 = vmatpush3.bf16.msra.mxu0 %v1925_v5  ;;  %v1929_v9 = vld [vmem:[%s2504_s2 + $0x10] sm:$0xff]   ;;  %s2541_s18 = smov (!%p585_p5, %s1619_s18), 7  ;;  %v1931_v11 = vld [vmem:[%s2504_s2 + $0x18] sm:$0xff]   ;;  %v1933_v13 = vld [vmem:[%s2504_s2 + $0x20] sm:$0xff]   ;;  %1779 = vmatprep.mubr.msk.bf16.mxu1 %vm2061_vm0, %v2059_v3  ;;  %v2362_v44 = vshrl.u32 %v930_v43, 7  ;;  %vm1459_vm13 = vcmask 523264  }
  0x53   : > { %1698 = vmatprep.subr.bf16.mxu0 %v1926_v6  ;;  %s1620_s30 = sshll.u32 %s2541_s18, 2  ;;  %s1691_s20 = sshll.u32 %s2541_s18, 3  ;;  %v1934_v14 = vld [vmem:[%s2504_s2 + $0x68] sm:$0xff]   ;;  %v1936_v20 = vld [vmem:[%s2504_s2 + $0x70] sm:$0xff]   ;;  %v1938_v23 = vld [vmem:[%s2504_s2 + $0x78] sm:$0xff]   ;;  %vm1477_vm14 = vcmask 7168  }
  0x54   : > { %v1935_v19 = vld [vmem:[%s2504_s2 + $0x28] sm:$0xff]   ;;  %v1937_v22 = vld [vmem:[%s2504_s2 + $0x30] sm:$0xff]   ;;  %v1947_v24 = vld [vmem:[%s2506_s4] sm:$0xff]   ;;  %v932_v47 = vsub.s32 0, %v2362_v44  ;;  %v946_v49 = vsub.s32 1, %v2362_v44  ;;  %v962_v50 = vsub.s32 2, %v2362_v44 }
  0x55   : > { %v1939_v25 = vld [vmem:[%s2504_s2 + $0x38] sm:$0xff]   ;;  %1764 = vmatpush3.bf16.msra.mxu1 %v1947_v24  ;;  %v1943_v28 = vld [vmem:[%s2510_s8] sm:$0xff]   ;;  %v1944_v29 = vld [vmem:[%s2510_s8 + $0x8] sm:$0xff]   ;;  %p597_p9 = scmp.lt.s32.totalorder %s2161_s27, 3  ;;  %vm1523_vm15 = vcmask 15360  }
  0x56   : > { %1699 = vmatpush3.bf16.msra.mxu0 %v1927_v7  ;;  %s588_s29 = scalar_lea.vmem %s2537_s25, %s1620_s30  ;;  %1765 = vmatprep.subr.bf16.mxu1 %v2059_v3  ;;  %v1949_v30 = vld [vmem:[%s2506_s4 + $0x8] sm:$0xff]   ;;  %v1945_v31 = vld [vmem:[%s2510_s8 + $0x10] sm:$0xff]   ;;  %v1946_v33 = vld [vmem:[%s2510_s8 + $0x18] sm:$0xff]  }
  0x57   : > { %1700 = vmatprep.subr.bf16.mxu0 %v1928_v8  ;;  %s595_s16 = scalar_lea.vmem %s2538_s0, %s1691_s20  ;;  %v1693_v16 = vld [vmem:[%s588_s29] sm:$0xff]   ;;  %v1951_v32 = vld [vmem:[%s2506_s4 + $0x10] sm:$0xff]   ;;  %v1953_v34 = vld [vmem:[%s2506_s4 + $0x18] sm:$0xff]   ;;  %s2543_s27 = smov (!%p597_p9, %s2161_s27), 3 }
  0x58   : > { %v1942_v15 = vld [vmem:[%s595_s16 + $0x4] ss:$8 sps:$4 sm:$0xff]   ;;  %v1694_v17 = vunpack.c.l.bf16 %v1693_v16  ;;  %v1695_v18 = vunpack.c.h.bf16 %v1693_v16  ;;  %v1940_v27 = vld [vmem:[%s595_s16] ss:$8 sps:$4 sm:$0xff]   ;;  %v1952_v38 = vld [vmem:[%s2510_s8 + $0x30] sm:$0xff]   ;;  %s599_s26 = scalar_lea.vmem %s2519_s17, %s2543_s27 }
  0x59   : > { %780 = vmatprep.mubr.bf16.mxu0 %v1942_v15  ;;  %1766 = vmatpush3.bf16.msra.mxu1 %v1949_v30  ;;  %v1948_v35 = vld [vmem:[%s2510_s8 + $0x20] sm:$0xff]   ;;  %v1950_v37 = vld [vmem:[%s2510_s8 + $0x28] sm:$0xff]   ;;  %v1954_v39 = vld [vmem:[%s2510_s8 + $0x38] sm:$0xff]  }
  0x5a   : > { %1701 = vmatpush3.bf16.msra.mxu0 %v1929_v9  ;;  %v1906_v21 = vpack.i.bf16 %v1695_v18, %v1694_v17  ;;  %1767 = vmatprep.subr.bf16.mxu1 %v2059_v3  ;;  %v1955_v36 = vld [vmem:[%s2506_s4 + $0x20] sm:$0xff]   ;;  %v1956_v40 = vld [vmem:[%s2506_s4 + $0x28] sm:$0xff]   ;;  %v1957_v41 = vld [vmem:[%s2506_s4 + $0x30] sm:$0xff]  }
  0x5b   : > { %1702 = vmatprep.subr.bf16.mxu0 %v1930_v10  ;;  %v1958_v42 = vld [vmem:[%s2506_s4 + $0x38] sm:$0xff]   ;;  %v918_v45 = vld [vmem:[#allocation5] sm:$0x3]  ;;  %v1652_v7 = vld [vmem:[%s2509_s7] ss:$0 sm:$0xff] }
  0x5c   : > { %1907 = vperm.xlu0 %1905, %v1906_v21   ;;  %1919 = vperm.xlu1 %1917, %v1906_v21   ;;  %v919_v46 = vunpack.c.l.bf16 %v918_v45  ;;  %v1959_v16 = vld [vmem:[%s2512_s10] sm:$0xff]   ;;  %v1960_v18 = vld [vmem:[%s2512_s10 + $0x8] sm:$0xff]  }
  0x5d   : > { %1768 = vmatpush3.bf16.msra.mxu1 %v1951_v32  ;;  %v1624_v24 = vld [vmem:[%s2505_s3] ss:$0 sm:$0xff]  ;;  %v1972_v45 = vld [vmem:[%s2513_s11 + $0x28] sm:$0xff]  }
  0x5e   : > { %1703 = vmatpush3.bf16.msra.mxu0 %v1931_v11  ;;  %1769 = vmatprep.subr.bf16.mxu1 %v2059_v3  ;;  %v933_v52 = vrot.slane %v919_v46, %v932_v47  ;;  %v947_v55 = vrot.slane %v919_v46, %v946_v49  ;;  %v963_v56 = vrot.slane %v919_v46, %v962_v50  ;;  %v1971_v43 = vld [vmem:[%s2513_s11 + $0x20] sm:$0xff]   ;;  %v1973_v46 = vld [vmem:[%s2513_s11 + $0x30] sm:$0xff]  }
  0x5f   : > { %1704 = vmatprep.subr.bf16.mxu0 %v1932_v12  ;;  %v1653_v49 = vld [vmem:[%s2511_s9] ss:$0 sm:$0xff] }
  0x60   : > { %1911 = vset.pattern.permute.xlu0 %v2060_v26 }
  0x61   : > { %1913 = vperm.xlu0 %1911, %v1906_v21   ;;  %1770 = vmatpush3.bf16.msra.mxu1 %v1953_v34  ;;  %v1964_v21 = vld [vmem:[%s2512_s10 + $0x20] sm:$0xff]  }
  0x62   : > { %1705 = vmatpush3.bf16.msra.mxu0 %v1933_v13  ;;  %1771 = vmatprep.subr.bf16.mxu1 %v2059_v3 }
  0x63   : > { %1706 = vmatprep.subr.bf16.mxu0 %v1934_v14 }
  0x65   : > { %1923 = vset.pattern.permute.xlu0 %v2058_v2  ;;  %1772 = vmatpush3.bf16.msra.mxu1 %v1955_v36  ;;  %v1963_v36 = vld [vmem:[%s2513_s11] sm:$0xff]  }
  0x66   : > { %1707 = vmatpush3.bf16.msra.mxu0 %v1935_v19  ;;  %1773 = vmatprep.subr.bf16.mxu1 %v2059_v3  ;;  %v1961_v19 = vld [vmem:[%s2512_s10 + $0x10] sm:$0xff]  }
  0x67   : > { %1708 = vmatprep.subr.bf16.mxu0 %v1936_v20  ;;  %v1962_v20 = vld [vmem:[%s2512_s10 + $0x18] sm:$0xff]  }
  0x69   : > { %1774 = vmatpush3.bf16.msra.mxu1 %v1956_v40  ;;  %v1967_v40 = vld [vmem:[%s2513_s11 + $0x10] sm:$0xff]  }
  0x6a   : > { %1709 = vmatpush3.bf16.msra.mxu0 %v1937_v22  ;;  %1775 = vmatprep.subr.bf16.mxu1 %v2059_v3  ;;  %v1966_v22 = vld [vmem:[%s2512_s10 + $0x28] sm:$0xff]  }
  0x6b   : > { %1710 = vmatprep.subr.bf16.mxu0 %v1938_v23 }
  0x6d   : > { %1776 = vmatpush3.bf16.msra.mxu1 %v1957_v41  ;;  %v1970_v41 = vld [vmem:[%s2512_s10 + $0x38] sm:$0xff]  }
  0x6e   : > { %1711 = vmatpush3.bf16.msra.mxu0 %v1939_v25  ;;  %1777 = vmatprep.subr.bf16.mxu1 %v2059_v3 }
  0x6f   : > { %1783 = vmatprep.subr.bf16.mxu0 %v2059_v3 }
  0x71   : > { %781 = vmatmul.mubr.bf16.vlgmr.msra.gmra.mrb[0].mxu0 %v1940_v27  ;;  %1778 = vmatpush3.bf16.msra.mxu1 %v1958_v42  ;;  %v1969_v42 = vld [vmem:[%s2513_s11 + $0x18] sm:$0xff]  }
  0x72   : > { %1784 = vmatpush3.bf16.msra.mxu0 %v1943_v28  ;;  %1799 = vmatprep.mubr.msk.bf16.mxu0 %vm2061_vm0, %v2059_v3 }
  0x73   : > { %1785 = vmatprep.subr.bf16.mxu0 %v2059_v3  ;;  %1803 = vmatprep.subr.bf16.mxu1 %v2059_v3 }
  0x76   : > { %1786 = vmatpush3.bf16.msra.mxu0 %v1944_v29 }
  0x77   : > { %1787 = vmatprep.subr.bf16.mxu0 %v2059_v3 }
  0x7a   : > { %1788 = vmatpush3.bf16.msra.mxu0 %v1945_v31 }
  0x7b   : > { %1789 = vmatprep.subr.bf16.mxu0 %v2059_v3 }
  0x7e   : > { %1790 = vmatpush3.bf16.msra.mxu0 %v1946_v33 }
  0x7f   : > { %1791 = vmatprep.subr.bf16.mxu0 %v2059_v3 }
  0x82   : > { %1792 = vmatpush3.bf16.msra.mxu0 %v1948_v35 }
  0x83   : > { %1793 = vmatprep.subr.bf16.mxu0 %v2059_v3 }
  0x86   : > { %1794 = vmatpush3.bf16.msra.mxu0 %v1950_v37 }
  0x87   : > { %1795 = vmatprep.subr.bf16.mxu0 %v2059_v3 }
  0x8a   : > { %1796 = vmatpush3.bf16.msra.mxu0 %v1952_v38  ;;  %v1965_v38 = vld [vmem:[%s2513_s11 + $0x8] sm:$0xff]  }
  0x8b   : > { %1797 = vmatprep.subr.bf16.mxu0 %v2059_v3 }
  0x8e   : > { %1798 = vmatpush3.bf16.msra.mxu0 %v1954_v39  ;;  %v1968_v39 = vld [vmem:[%s2512_s10 + $0x30] sm:$0xff]  }
  0x8f   : > { %1823 = vmatprep.subr.bf16.mxu0 %v2059_v3 }
  0xdb   : > { %v1908_v48 = vpop.permute.xlu0 %1907  ;;  %v1920_v51 = vpop.permute.xlu1 %1919 }
  0xdc   : > { %v1910_v53 = vunpack.i.h.bf16 %v1908_v48  ;;  %v1909_v54 = vunpack.i.l.bf16 %v1908_v48  ;;  %v1922_v57 = vunpack.i.h.bf16 %v1920_v51  ;;  %v1921_v58 = vunpack.i.l.bf16 %v1920_v51  ;;  %v1974_v48 = vld [vmem:[%s2513_s11 + $0x38] sm:$0xff]  }
  0xde   : > { %v935_v60 = vmul.f32 %v1910_v53, %v933_v52  ;;  %v934_v61 = vmul.f32 %v1909_v54, %v933_v52  ;;  %v965_v2 = vmul.f32 %v1922_v57, %v963_v56  ;;  %v964_v4 = vmul.f32 %v1921_v58, %v963_v56 }
  0xe0   : > { %v1914_v59 = vpop.permute.xlu0 %1913 }
  0xe1   : > { %v1916_v62 = vunpack.i.h.bf16 %v1914_v59  ;;  %v1915_v63 = vunpack.i.l.bf16 %v1914_v59 }
  0xe3   : > { %v949_v0 = vmul.f32 %v1916_v62, %v947_v55  ;;  %v948_v1 = vmul.f32 %v1915_v63, %v947_v55 }
  0xe5   : > { %v950_v5 = vadd.f32 %v948_v1, %v934_v61  ;;  %v951_v6 = vadd.f32 %v949_v0, %v935_v60  ;;  %v1643_v61 = vld [vmem:[#allocation3] ss:$0 sm:$0xff] }
  0xe7   : > { %v966_v8 = vadd.f32 %v964_v4, %v950_v5  ;;  %v967_v9 = vadd.f32 %v965_v2, %v951_v6 }
  0xe9   : > { %v975_v10 = vadd.f32 %v1652_v7, %v966_v8  ;;  %v976_v11 = vadd.f32 %v1652_v7, %v967_v9  ;;  %v1975_v9 = vld [vmem:[%s2515_s13] sm:$0xff]  }
  0xeb   : > { %v979_v12 = vmul.f32 0.01, %v975_v10  ;;  %v980_v13 = vmul.f32 0.01, %v976_v11  ;;  %vm977_vm1 = vcmp.ge.f32.partialorder %v975_v10, 0.0  ;;  %vm978_vm2 = vcmp.ge.f32.partialorder %v976_v11, 0.0 }
  0xed   : > { %v981_v14 = vsel %vm977_vm1, %v975_v10, %v979_v12  ;;  %v982_v15 = vsel %vm978_vm2, %v976_v11, %v980_v13  ;;  %v1976_v11 = vld [vmem:[%s2515_s13 + $0x8] sm:$0xff]   ;;  %v1977_v12 = vld [vmem:[%s2515_s13 + $0x10] sm:$0xff]   ;;  %v1978_v13 = vld [vmem:[%s2515_s13 + $0x18] sm:$0xff]   ;;  %vm1527_vm1 = vcmask 24576  }
  0xee   : > { %v983_v17 = vpack.c.bf16 %v982_v15, %v981_v14  ;;  %v1979_v14 = vld [vmem:[%s2515_s13 + $0x20] sm:$0xff]   ;;  %v1980_v15 = vld [vmem:[%s2515_s13 + $0x28] sm:$0xff]  }
  0xf0   : > { %1800 = vmatmul.mubr.bf16.vlgmr.msra.gmra.mrb[4].mxu0 %v983_v17  ;;  %v1982_v17 = vld [vmem:[%s2515_s13 + $0x38] sm:$0xff]  }
  0xf1   : > { %1824 = vmatpush3.bf16.msra.mxu0 %v1959_v16  ;;  %1839 = vmatprep.mubr.msk.bf16.mxu0 %vm2061_vm0, %v2059_v3  ;;  %v1981_v16 = vld [vmem:[%s2515_s13 + $0x30] sm:$0xff]  }
  0xf2   : > { %1825 = vmatprep.subr.bf16.mxu0 %v2059_v3 }
  0xf5   : > { %1826 = vmatpush3.bf16.msra.mxu0 %v1960_v18 }
  0xf6   : > { %1827 = vmatprep.subr.bf16.mxu0 %v2059_v3 }
  0xf9   : > { %1828 = vmatpush3.bf16.msra.mxu0 %v1961_v19 }
  0xfa   : > { %1829 = vmatprep.subr.bf16.mxu0 %v2059_v3 }
  0xfd   : > { %1830 = vmatpush3.bf16.msra.mxu0 %v1962_v20 }
  0xfe   : > { %1831 = vmatprep.subr.bf16.mxu0 %v2059_v3 }
 0x101   : > { %1832 = vmatpush3.bf16.msra.mxu0 %v1964_v21 }
 0x102   : > { %1833 = vmatprep.subr.bf16.mxu0 %v2059_v3 }
 0x105   : > { %1834 = vmatpush3.bf16.msra.mxu0 %v1966_v22 }
 0x106   : > { %1835 = vmatprep.subr.bf16.mxu0 %v2059_v3 }
 0x109   : > { %1836 = vmatpush3.bf16.msra.mxu0 %v1968_v39  ;;  %v1451_v39 = vld [vmem:[%s2517_s15] sm:$0x1] }
 0x10a   : > { %1837 = vmatprep.subr.bf16.mxu0 %v2059_v3 }
 0x10d   : > { %1838 = vmatpush3.bf16.msra.mxu0 %v1970_v41 }
 0x144   : > { %v1712_v23 = vpop.f32.mrb[0].mxu0 }
 0x145   : > { %v1713_v25 = vpop.f32.mrb[1].mxu0 }
 0x146   : > { %v1714_v26 = vadd.f32 %v1713_v25, %v1712_v23  ;;  %v1715_v27 = vpop.f32.mrb[2].mxu0  ;;  %v1678_v23 = vld [vmem:[%s2514_s12] ss:$0 sm:$0xff] }
 0x147   : > { %v1716_v28 = vpop.f32.mrb[3].mxu0 }
 0x148   : > { %v783_v29 = vadd.f32 %v1714_v26, %v1624_v24  ;;  %v1717_v30 = vadd.f32 %v1716_v28, %v1715_v27 }
 0x14a   : > { %v791_v31 = vmul.f32 0.01, %v783_v29  ;;  %v786_v32 = vadd.f32 %v1717_v30, %v1624_v24  ;;  %vm789_vm3 = vcmp.ge.f32.partialorder %v783_v29, 0.0 }
 0x14c   : > { %vm790_vm4 = vcmp.ge.f32.partialorder %v786_v32, 0.0  ;;  %v792_v33 = vmul.f32 0.01, %v786_v32  ;;  %v793_v34 = vsel %vm789_vm3, %v783_v29, %v791_v31 }
 0x14e   : > { %v794_v35 = vsel %vm790_vm4, %v786_v32, %v792_v33 }
 0x14f   : > { %v795_v37 = vpack.c.bf16 %v794_v35, %v793_v34  ;;  %v1679_v35 = vld [vmem:[%s2516_s14] ss:$0 sm:$0xff] }
 0x151   : > { %1780 = vmatmul.mubr.bf16.vlgmr.msra.gmra.mrb[0].mxu1 %v795_v37 }
 0x152   : > { %1804 = vmatpush3.bf16.msra.mxu1 %v1963_v36  ;;  %1819 = vmatprep.mubr.msk.bf16.mxu1 %vm2061_vm0, %v2059_v3 }
 0x153   : > { %1805 = vmatprep.subr.bf16.mxu1 %v2059_v3 }
 0x156   : > { %1806 = vmatpush3.bf16.msra.mxu1 %v1965_v38 }
 0x157   : > { %1807 = vmatprep.subr.bf16.mxu1 %v2059_v3 }
 0x15a   : > { %1808 = vmatpush3.bf16.msra.mxu1 %v1967_v40 }
 0x15b   : > { %1809 = vmatprep.subr.bf16.mxu1 %v2059_v3 }
 0x15e   : > { %1810 = vmatpush3.bf16.msra.mxu1 %v1969_v42 }
 0x15f   : > { %1811 = vmatprep.subr.bf16.mxu1 %v2059_v3 }
 0x162   : > { %1812 = vmatpush3.bf16.msra.mxu1 %v1971_v43 }
 0x163   : > { %1813 = vmatprep.subr.bf16.mxu1 %v2059_v3 }
 0x166   : > { %1814 = vmatpush3.bf16.msra.mxu1 %v1972_v45  ;;  %v1452_v45 = vunpack.c.l.bf16 %v1451_v39 }
 0x167   : > { %1815 = vmatprep.subr.bf16.mxu1 %v2059_v3 }
 0x16a   : > { %1816 = vmatpush3.bf16.msra.mxu1 %v1973_v46 }
 0x16b   : > { %1817 = vmatprep.subr.bf16.mxu1 %v2059_v3 }
 0x16e   : > { %1818 = vmatpush3.bf16.msra.mxu1 %v1974_v48 }
 0x16f   : > { %1843 = vmatprep.subr.bf16.mxu1 %v2059_v3 }
 0x1c3   : > { %v1089_v50 = vpop.f32.mrb[4].mxu0 }
 0x1c4   : > { %v1090_v51 = vadd.f32 %v1653_v49, %v1089_v50  ;;  %v1801_v52 = vpop.f32.mrb[5].mxu0 }
 0x1c5   : > { %v1092_v53 = vpop.f32.mrb[6].mxu0 }
 0x1c6   : > { %vm1096_vm5 = vcmp.ge.f32.partialorder %v1090_v51, 0.0  ;;  %v1098_v54 = vmul.f32 0.01, %v1090_v51  ;;  %v1093_v55 = vadd.f32 %v1653_v49, %v1092_v53  ;;  %v1802_v56 = vpop.f32.mrb[7].mxu0 }
 0x1c8   : > { %v1100_v57 = vsel %vm1096_vm5, %v1090_v51, %v1098_v54  ;;  %vm1097_vm6 = vcmp.ge.f32.partialorder %v1093_v55, 0.0  ;;  %v1099_v58 = vmul.f32 0.01, %v1093_v55  ;;  %v1456_v51 = vrot.slane %v1452_v45, %v932_v47 }
 0x1ca   : > { %v1101_v59 = vsel %vm1097_vm6, %v1093_v55, %v1099_v58  ;;  %v1688_v58 = vld [vmem:[#allocation2] ss:$0 sm:$0xff] }
 0x1cb   : > { %v1102_v60 = vpack.c.bf16 %v1101_v59, %v1100_v57 }
 0x1cd   : > { %1840 = vmatmul.mubr.bf16.vlgmr.msra.gmra.mrb[8].mxu0 %v1102_v60 }
 0x224   : > { %v901_v62 = vpop.f32.mrb[0].mxu1 }
 0x225   : > { %v902_v63 = vadd.f32 %v1643_v61, %v901_v62  ;;  %v1781_v0 = vpop.f32.mrb[1].mxu1 }
 0x226   : > { %v904_v1 = vpop.f32.mrb[2].mxu1 }
 0x227   : > { %v910_v2 = vmul.f32 0.01, %v902_v63  ;;  %v905_v4 = vadd.f32 %v1643_v61, %v904_v1  ;;  %v1782_v5 = vpop.f32.mrb[3].mxu1  ;;  %vm908_vm7 = vcmp.ge.f32.partialorder %v902_v63, 0.0 }
 0x229   : > { %vm909_vm8 = vcmp.ge.f32.partialorder %v905_v4, 0.0  ;;  %v911_v6 = vmul.f32 0.01, %v905_v4  ;;  %v912_v7 = vsel %vm908_vm7, %v902_v63, %v910_v2 }
 0x22b   : > { %v913_v8 = vsel %vm909_vm8, %v905_v4, %v911_v6 }
 0x22c   : > { %v1119_v10 = vpack.c.bf16 %v913_v8, %v912_v7 }
 0x22e   : > { %1820 = vmatmul.mubr.bf16.vlgmr.msra.gmra.mrb[4].mxu1 %v1119_v10 }
 0x22f   : > { %1844 = vmatpush3.bf16.msra.mxu1 %v1975_v9  ;;  %1859 = vmatprep.mubr.msk.bf16.mxu1 %vm2061_vm0, %v2059_v3  ;;  %vm1525_vm0 = vcmask 23552  }
 0x230   : > { %1845 = vmatprep.subr.bf16.mxu1 %v2059_v3 }
 0x233   : > { %1846 = vmatpush3.bf16.msra.mxu1 %v1976_v11 }
 0x234   : > { %1847 = vmatprep.subr.bf16.mxu1 %v2059_v3 }
 0x237   : > { %1848 = vmatpush3.bf16.msra.mxu1 %v1977_v12 }
 0x238   : > { %1849 = vmatprep.subr.bf16.mxu1 %v2059_v3 }
 0x23b   : > { %1850 = vmatpush3.bf16.msra.mxu1 %v1978_v13 }
 0x23c   : > { %1851 = vmatprep.subr.bf16.mxu1 %v2059_v3 }
 0x23f   : > { %1852 = vmatpush3.bf16.msra.mxu1 %v1979_v14 }
 0x240   : > { %1853 = vmatprep.subr.bf16.mxu1 %v2059_v3 }
 0x243   : > { %1854 = vmatpush3.bf16.msra.mxu1 %v1980_v15 }
 0x244   : > { %1855 = vmatprep.subr.bf16.mxu1 %v2059_v3 }
 0x247   : > { %1856 = vmatpush3.bf16.msra.mxu1 %v1981_v16 }
 0x248   : > { %1857 = vmatprep.subr.bf16.mxu1 %v2059_v3 }
 0x24b   : > { %1858 = vmatpush3.bf16.msra.mxu1 %v1982_v17 }
 0x2a0   : > { %v1307_v18 = vpop.f32.mrb[8].mxu0 }
 0x2a1   : > { %v1841_v19 = vpop.f32.mrb[9].mxu0 }
 0x2a2   : > { %v1310_v20 = vpop.f32.mrb[10].mxu0 }
 0x2a3   : > { %v1842_v21 = vpop.f32.mrb[11].mxu0 }
 0x301   : > { %v1218_v22 = vpop.f32.mrb[4].mxu1 }
 0x302   : > { %v1308_v24 = vadd.f32 %v1307_v18, %v1218_v22  ;;  %v1821_v25 = vpop.f32.mrb[5].mxu1 }
 0x303   : > { %v1221_v26 = vpop.f32.mrb[6].mxu1 }
 0x304   : > { %v1321_v27 = vadd.f32 %v1678_v23, %v1308_v24  ;;  %v1311_v28 = vadd.f32 %v1310_v20, %v1221_v26  ;;  %v1822_v3 = vpop.f32.mrb[7].mxu1 }
 0x306   : > { %v1325_v29 = vmul.f32 0.01, %v1321_v27  ;;  %v1322_v30 = vadd.f32 %v1678_v23, %v1311_v28  ;;  %vm1323_vm9 = vcmp.ge.f32.partialorder %v1321_v27, 0.0 }
 0x308   : > { %vm1324_vm10 = vcmp.ge.f32.partialorder %v1322_v30, 0.0  ;;  %v1326_v31 = vmul.f32 0.01, %v1322_v30  ;;  %v1327_v32 = vsel %vm1323_vm9, %v1321_v27, %v1325_v29 }
 0x30a   : > { %v1328_v33 = vsel %vm1324_vm10, %v1322_v30, %v1326_v31 }
 0x30b   : > { %v1329_v34 = vpack.c.bf16 %v1328_v33, %v1327_v32 }
 0x30d   : > { %1860 = vmatmul.mubr.bf16.vlgmr.msra.gmra.mrb[8].mxu1 %v1329_v34 }
 0x3e0   : > { %v1435_v36 = vpop.f32.mrb[8].mxu1 }
 0x3e1   : > { %v1436_v37 = vadd.f32 %v1679_v35, %v1435_v36  ;;  %v1861_v38 = vpop.f32.mrb[9].mxu1 }
 0x3e2   : > { %v1438_v40 = vpop.f32.mrb[10].mxu1 }
 0x3e3   : > { %v1444_v41 = vmul.f32 0.01, %v1436_v37  ;;  %v1439_v42 = vadd.f32 %v1679_v35, %v1438_v40  ;;  %v1862_v43 = vpop.f32.mrb[11].mxu1  ;;  %vm1442_vm11 = vcmp.ge.f32.partialorder %v1436_v37, 0.0 }
 0x3e5   : > { %vm1443_vm12 = vcmp.ge.f32.partialorder %v1439_v42, 0.0  ;;  %v1445_v46 = vmul.f32 0.01, %v1439_v42  ;;  %v1446_v48 = vsel %vm1442_vm11, %v1436_v37, %v1444_v41 }
 0x3e7   : > { %v1447_v49 = vsel %vm1443_vm12, %v1439_v42, %v1445_v46 }
 0x3e8   : > { %v1448_v50 = vpack.c.bf16 %v1447_v49, %v1446_v48 }
 0x3ea   : > { %v1450_v52 = vunpack.c.h.bf16 %v1448_v50  ;;  %v1449_v53 = vunpack.c.l.bf16 %v1448_v50 }
 0x3ec   : > { %v1458_v54 = vmul.f32 %v1456_v51, %v1450_v52  ;;  %v1457_v55 = vmul.f32 %v1456_v51, %v1449_v53 }
 0x3ee   : > { %v1463_v56 = vsel %vm1459_vm13, %v1458_v54, 0.0  ;;  %v1460_v57 = vsel %vm1459_vm13, %v1457_v55, 0.0 }
 0x3ef   : > { %1464 = vadd.xlane.f32.xlu0 %v1463_v56  ;;  %1461 = vadd.xlane.f32.xlu1 %v1460_v57 }
 0x47c   : > { %v1465_v59 = vpop.xlane.xlu0 %1464  ;;  %v1462_v60 = vpop.xlane.xlu1 %1461 }
 0x47d   : > { %v1474_v61 = vadd.f32 %v1688_v58, %v1465_v59  ;;  %v1473_v62 = vadd.f32 %v1688_v58, %v1462_v60 }
 0x47f   : > { %v1489_v63 = vsel %vm1477_vm14, %v1474_v61, 0.0  ;;  %v1478_v44 = vsel %vm1477_vm14, %v1473_v62, 0.0  ;;  %v1476_v47 = vand.u32 2147483647, %v1474_v61  ;;  %v1475_v0 = vand.u32 2147483647, %v1473_v62 }
 0x480   : > { %1490 = vadd.xlane.f32.xlu0 %v1489_v63  ;;  %1479 = vadd.xlane.f32.xlu1 %v1478_v44 }
 0x481   : > { %v1511_v1 = vsel %vm1477_vm14, %v1476_v47, 0.0  ;;  %v1500_v2 = vsel %vm1477_vm14, %v1475_v0, 0.0 }
 0x484   : > { %1512 = vadd.xlane.f32.xlu0 %v1511_v1  ;;  %1501 = vadd.xlane.f32.xlu1 %v1500_v2 }
 0x50d   : > { %v1491_v4 = vpop.xlane.xlu0 %1490  ;;  %v1480_v5 = vpop.xlane.xlu1 %1479 }
 0x50e   : > { %v1492_v6 = vrot.slane %v1491_v4, 4  ;;  %v1481_v7 = vrot.slane %v1480_v5, 4 }
 0x510   : > { %v1493_v8 = vadd.f32 %v1492_v6, %v1491_v4  ;;  %v1482_v9 = vadd.f32 %v1481_v7, %v1480_v5 }
 0x511   : > { %v1513_v10 = vpop.xlane.xlu0 %1512  ;;  %v1502_v11 = vpop.xlane.xlu1 %1501 }
 0x512   : > { %v1494_v12 = vrot.slane %v1493_v8, 2  ;;  %v1483_v13 = vrot.slane %v1482_v9, 2  ;;  %v1514_v14 = vrot.slane %v1513_v10, 4  ;;  %v1503_v15 = vrot.slane %v1502_v11, 4 }
 0x514   : > { %v1515_v16 = vadd.f32 %v1514_v14, %v1513_v10  ;;  %v1504_v17 = vadd.f32 %v1503_v15, %v1502_v11  ;;  %v1484_v18 = vadd.f32 %v1483_v13, %v1482_v9  ;;  %v1495_v19 = vadd.f32 %v1494_v12, %v1493_v8 }
 0x516   : > { %v1516_v20 = vrot.slane %v1515_v16, 2  ;;  %v1505_v21 = vrot.slane %v1504_v17, 2  ;;  %v1485_v22 = vrot.slane %v1484_v18, 1  ;;  %v1496_v23 = vrot.slane %v1495_v19, 1 }
 0x518   : > { %v1517_v24 = vadd.f32 %v1516_v20, %v1515_v16  ;;  %v1506_v25 = vadd.f32 %v1505_v21, %v1504_v17  ;;  %v1486_v26 = vadd.f32 %v1485_v22, %v1484_v18  ;;  %v1497_v27 = vadd.f32 %v1496_v23, %v1495_v19 }
 0x51a   : > { %1863 = vpush %v1486_v26  ;;  %v1507_v28 = vrot.slane %v1506_v25, 1  ;;  %v1518_v3 = vrot.slane %v1517_v24, 1 }
 0x51b   : > { %1865 = vpush %v1497_v27 }
 0x51c   : > { %v1508_v29 = vadd.f32 %v1507_v28, %v1506_v25  ;;  %v1519_v30 = vadd.f32 %v1518_v3, %v1517_v24 }
 0x51e   : > { %1867 = vpush %v1508_v29 }
 0x51f   : > { %1869 = vpush %v1519_v30 }
 0x54b   : > { %s1864_s16 = spop %1863 }
 0x54c   : > { %s1866_s1 = spop %1865  ;;  %v1488_v31 = vstv %s1864_s16 }
 0x54d   : > { %v1499_v32 = vstv %s1866_s1 }
 0x54e   : > { %v1522_v33 = vsel %vm1477_vm14, %v1488_v31, %v1499_v32 }
 0x54f   : > { %s1868_s5 = spop %1867 }
 0x550   : > { %v1510_v34 = vstv %s1868_s5  ;;  %s1870_s21 = spop %1869 }
 0x551   : > { %v1524_v35 = vsel %vm1523_vm15, %v1522_v33, %v1510_v34  ;;  %v1521_v36 = vstv %s1870_s21 }
 0x552   : > { %v1526_v37 = vsel %vm1525_vm0, %v1524_v35, %v1521_v36 }
 0x553   : > { %1528 = vst.msk [vmem:[%s599_s26] sm:$0x1] %vm1527_vm1, %v1526_v37 }
 0x554 PF: > { %s2539_s22 = sld [smem:[#allocation9_spill]] }
 0x55a   : > { %s31_s26 = sadd.s32 1, %s2539_s22  }
 0x55b   : > { %p28_p10 = scmp.ge.s32.totalorder %s31_s26, 6  }
 0x55d   :  { %30 = sbr.rel (!%p28_p10) target bundleno = 7 (0x7), region = 130 }
 0x564   :  { %1546 = vsyncpa [#allocation4], 1 }
 0x565   :  { %1548 = vsyncpa [#allocation4 + $0x1], 1 }
 0x566   :  { %1549 = vsyncpa [#allocation6], 1 }

</bundles_post_ra>
